<compile_context>
chip_gen: v7x
topology: tpu7x:2x2x1
jax: 0.10.0
libtpu: 0.0.40
codegen_flags: <defaults>
</compile_context>

<pallas_src>
import numpy as np
import jax
import jax.numpy as jnp
from jax import lax
from jax.experimental import pallas as pl
from jax.experimental.pallas import tpu as pltpu


# ----------------------------------------------------------------------------
# Diffusion schedule (mirrors cosine_beta_schedule + the registered buffers)
# ----------------------------------------------------------------------------
def cosine_beta_schedule(timesteps, s=0.008):
    steps = timesteps + 1
    x = np.linspace(0, timesteps, steps, dtype=np.float64)
    alphas_cumprod = np.cos(((x / timesteps) + s) / (1 + s) * np.pi * 0.5) ** 2
    alphas_cumprod = alphas_cumprod / alphas_cumprod[0]
    betas = 1.0 - (alphas_cumprod[1:] / alphas_cumprod[:-1])
    return np.clip(betas, 0.0, 0.9999)


def make_buffers(num_timesteps):
    betas = cosine_beta_schedule(num_timesteps)
    alphas = 1.0 - betas
    alphas_cumprod = np.cumprod(alphas, axis=0)
    sqrt_alphas_cumprod = np.sqrt(alphas_cumprod).astype(np.float32)
    sqrt_one_minus_alphas_cumprod = np.sqrt(1.0 - alphas_cumprod).astype(np.float32)
    return sqrt_alphas_cumprod, sqrt_one_minus_alphas_cumprod


# ----------------------------------------------------------------------------
# Tiling helpers
# ----------------------------------------------------------------------------
def _pick_tile_n(N, target_elems=256 * 1024):
    """Largest per-channel tile (elements) dividing N.

    Prefers multiples of 2048 elements (16 f32 sublanes) so the in-kernel
    chunk loop stays vreg-aligned; falls back to multiples of 128.
    """
    # TODO(synk): resolutions where F*H*W is not a multiple of 128 need a
    # padded / masked-tail path instead of this assert.
    assert N % 128 == 0, "F*H*W must be a multiple of 128 for lane-dense tiles"
    if N <= target_elems:
        return N
    t = (target_elems // 2048) * 2048
    for cand in range(t, 0, -2048):
        if N % cand == 0:
            return cand
    t = (target_elems // 128) * 128
    for cand in range(t, 0, -128):
        if N % cand == 0:
            return cand
    return N


def _pick_chunk(ts):
    """Sublane rows per inner-loop step (keeps intermediates in vregs)."""
    if ts % 16 == 0:
        return 16
    if ts % 8 == 0:
        return 8
    return ts          # degenerate tiny-N case (single tile, TS < 8 or odd)


# ----------------------------------------------------------------------------
# Pallas kernel: fused normalize_img + q_sample + denoise stand-in + L1/MSE sums
# ----------------------------------------------------------------------------
def _make_kernel(C, CHUNK, nchunks, unroll):
    def kernel(a_ref, soma_ref, const_ref, w_ref,   # SMEM scalars / weights
               x_ref, noise_ref,                    # VMEM f32 tiles (C, TS, 128)
               l1_ref, mse_ref):                    # VMEM f32 per-(b,p) (8,128) partials
        b = pl.program_id(0)
        n = pl.program_id(2)

        # Output block for this (batch, parallel-split) is resident across all
        # n-tiles -> accumulator.
        @pl.when(n == 0)
        def _():
            l1_ref[...] = jnp.zeros_like(l1_ref)
            mse_ref[...] = jnp.zeros_like(mse_ref)

        a = a_ref[b]          # 2 * sqrt_alphas_cumprod[t_b]   (normalize folded in)
        soma = soma_ref[b]    # sqrt_one_minus_alphas_cumprod[t_b]
        consts = [const_ref[b * C + o] for o in range(C)]   # tnorm - sa*sum_c(w[o,c])

        def body(i, carry):
            l1_c, mse_c = carry
            s = pl.multiple_of(i * CHUNK, CHUNK)
            xc = x_ref[:, pl.ds(s, CHUNK), :]       # (C, CHUNK, 128) f32
            nc = noise_ref[:, pl.ds(s, CHUNK), :]
            # q_sample with normalize_img folded: a*x + soma*noise (the -sa term
            # is carried by consts[o]).
            xn = [a * xc[c] + soma * nc[c] for c in range(C)]
            # denoise_fn stand-in: CxC channel mix as unrolled VPU FMAs + bias.
            # TODO(synk): the real denoise_fn (Unet3D) is an external injected
            # module; replaced with a deterministic synthetic channel mix.
            for o in range(C):
                r = w_ref[o, 0] * xn[0]
                for c in range(1, C):
                    r = r + w_ref[o, c] * xn[c]
                d = nc[o] - r - consts[o]           # diff reused for both losses
                l1_c = l1_c + jnp.abs(d)
                mse_c = mse_c + d * d
            return l1_c, mse_c

        zero = jnp.zeros((CHUNK, 128), jnp.float32)
        l1_c, mse_c = lax.fori_loop(0, nchunks, body, (zero, zero), unroll=unroll)

        if CHUNK % 8 == 0:
            folds = CHUNK // 8
            if folds > 1:
                l1_c = l1_c.reshape(folds, 8, 128).sum(axis=0)
                mse_c = mse_c.reshape(folds, 8, 128).sum(axis=0)
            # Plain VPU adds into the resident (8,128) accumulators.
            l1_ref[...] += l1_c
            mse_ref[...] += mse_c
        else:
            # Degenerate tiny-N path: scalar accumulate (wrapper reads [0, 0]).
            l1_ref[...] += jnp.sum(l1_c)
            mse_ref[...] += jnp.sum(mse_c)

    return kernel


def gaussian_diffusion_forward(x, t, noise, w_denoise,
                               sqrt_alphas_cumprod,
                               sqrt_one_minus_alphas_cumprod,
                               num_timesteps):
    """x, noise: (B, C, F, H, W) float32.  t: (B,) int32."""
    B, C, F, H, W = x.shape
    N = F * H * W

    TILE_N = _pick_tile_n(N)
    NT = N // TILE_N
    TS = TILE_N // 128

    # Outer parallel split of the N-tile axis so both v7x TensorCores get work
    # even when B is small; harmless on v5e/v6e (single TC).
    P = 2 if (NT >= 2 and NT % 2 == 0) else 1
    NPP = NT // P

    CHUNK = _pick_chunk(TS)
    nchunks = TS // CHUNK
    unroll = True if nchunks <= 8 else 2

    # f32 straight from HBM (no extra dtype-conversion pass).
    x_flat = x.reshape(B, C, N // 128, 128)
    noise_flat = noise.reshape(B, C, N // 128, 128)

    # extract(buffer, t, shape) -> per-batch scalars; normalize_img and the
    # stand-in net's time bias folded into the coefficients (cheap glue).
    sa = sqrt_alphas_cumprod[t].astype(jnp.float32)                 # (B,)
    soma = sqrt_one_minus_alphas_cumprod[t].astype(jnp.float32)     # (B,)
    a = 2.0 * sa                                                    # (B,)
    tnorm = t.astype(jnp.float32) / float(num_timesteps)            # (B,)
    w_rowsum = jnp.sum(w_denoise, axis=1)                           # (C,)
    const = (tnorm[:, None] - sa[:, None] * w_rowsum[None, :]).reshape(B * C)

    kernel = _make_kernel(C, CHUNK, nchunks, unroll)

    l1_acc, mse_acc = pl.pallas_call(
        kernel,
        out_shape=(jax.ShapeDtypeStruct((B * P, 8, 128), jnp.float32),
                   jax.ShapeDtypeStruct((B * P, 8, 128), jnp.float32)),
        grid_spec=pltpu.PrefetchScalarGridSpec(
            num_scalar_prefetch=0,
            grid=(B, P, NPP),
            in_specs=[
                pl.BlockSpec(memory_space=pltpu.SMEM),               # a    (B,)
                pl.BlockSpec(memory_space=pltpu.SMEM),               # soma (B,)
                pl.BlockSpec(memory_space=pltpu.SMEM),               # const (B*C,)
                pl.BlockSpec(memory_space=pltpu.SMEM),               # w    (C,C)
                pl.BlockSpec((None, C, TS, 128),
                             lambda b, p, n: (b, 0, p * NPP + n, 0)),  # x
                pl.BlockSpec((None, C, TS, 128),
                             lambda b, p, n: (b, 0, p * NPP + n, 0)),  # noise
            ],
            out_specs=(
                pl.BlockSpec((None, 8, 128), lambda b, p, n: (b * P + p, 0, 0)),
                pl.BlockSpec((None, 8, 128), lambda b, p, n: (b * P + p, 0, 0)),
            ),
        ),
        compiler_params=pltpu.CompilerParams(
            dimension_semantics=("parallel", "parallel", "arbitrary"),
            # 2 inputs x 2 buffers x (C*TILE_N*4B) ~ 16 MiB at the default tile
            # target -> comfortably under v7x's 64 MiB physical VMEM.
            vmem_limit_bytes=48 * 1024 * 1024),
    )(a, soma, const, w_denoise, x_flat, noise_flat)

    total = float(B * C * N)
    if CHUNK % 8 == 0:
        l1_loss = jnp.sum(l1_acc) / total      # F.l1_loss (mean reduction)
        mse_loss = jnp.sum(mse_acc) / total    # F.mse_loss (mean reduction)
    else:
        l1_loss = jnp.sum(l1_acc[:, 0, 0]) / total
        mse_loss = jnp.sum(mse_acc[:, 0, 0]) / total

    # TODO(synk): 'Dice Score', 'SSIM Index', 'PSNR Loss', 'NMI Loss' rely on
    # external helpers (mean_dice_score, SSIM3D, skimage PSNR/NMI) that run on
    # CPU/numpy in the reference and have no clean Pallas hot path here.
    return {"L1 Loss": l1_loss, "MSE Loss": mse_loss}


if __name__ == "__main__":
    # Small shapes consistent with (b, c, f, h, w) video input
    B, C, F, H, W = 2, 4, 8, 16, 16
    NUM_TIMESTEPS = 100

    key = jax.random.PRNGKey(0)
    k_x, k_t, k_noise = jax.random.split(key, 3)

    # Input video in [0, 1] (forward applies normalize_img)
    x = jax.random.uniform(k_x, (B, C, F, H, W), dtype=jnp.float32)
    # t ~ randint(0, num_timesteps, (B,))
    t = jax.random.randint(k_t, (B,), 0, NUM_TIMESTEPS, dtype=jnp.int32)
    # noise ~ N(0, 1) like torch.randn_like(x_start)
    noise = jax.random.normal(k_noise, (B, C, F, H, W), dtype=jnp.float32)

    # Deterministic synthetic denoise_fn parameters (channel-mixing matrix)
    w_denoise = (0.8 * jnp.eye(C, dtype=jnp.float32)
                 + 0.05 * jnp.ones((C, C), dtype=jnp.float32))

    sa_buf, soma_buf = make_buffers(NUM_TIMESTEPS)
    sa_buf = jnp.asarray(sa_buf)
    soma_buf = jnp.asarray(soma_buf)

    losses = gaussian_diffusion_forward(
        x, t, noise, w_denoise, sa_buf, soma_buf, NUM_TIMESTEPS)
    losses = jax.block_until_ready(losses)

    # Sanity check against a plain-JAX f32 reference of the same computation.
    x_norm = 2.0 * x - 1.0
    sa_b = sa_buf[t].reshape(B, 1, 1, 1, 1)
    soma_b = soma_buf[t].reshape(B, 1, 1, 1, 1)
    x_noisy = sa_b * x_norm + soma_b * noise
    x_recon = jnp.einsum("oc,bcfhw->bofhw", w_denoise, x_noisy,
                         precision=jax.lax.Precision.HIGHEST) \
        + (t.astype(jnp.float32) / NUM_TIMESTEPS).reshape(B, 1, 1, 1, 1)
    ref_l1 = jnp.mean(jnp.abs(noise - x_recon))
    ref_mse = jnp.mean((noise - x_recon) ** 2)
    assert np.allclose(losses["L1 Loss"], ref_l1, rtol=1e-4, atol=1e-5), \
        (losses["L1 Loss"], ref_l1)
    assert np.allclose(losses["MSE Loss"], ref_mse, rtol=1e-4, atol=1e-5), \
        (losses["MSE Loss"], ref_mse)

    print("KERNEL_OK")
</pallas_src>

<mosaic_0001>
module attributes {stable_mosaic.version = 11 : i64} {
  func.func @kernel(%arg0: i32, %arg1: i32, %arg2: i32, %arg3: memref<2xf32, #tpu.memory_space<smem>>, %arg4: memref<2xf32, #tpu.memory_space<smem>>, %arg5: memref<8xf32, #tpu.memory_space<smem>>, %arg6: memref<4x4xf32, #tpu.memory_space<smem>>, %arg7: memref<1x4x16x128xf32, #tpu.memory_space<vmem>>, %arg8: memref<1x4x16x128xf32, #tpu.memory_space<vmem>>, %arg9: memref<1x8x128xf32, #tpu.memory_space<vmem>>, %arg10: memref<1x8x128xf32, #tpu.memory_space<vmem>>) attributes {dimension_semantics = [#tpu.dimension_semantics<parallel>, #tpu.dimension_semantics<parallel>, #tpu.dimension_semantics<arbitrary>], iteration_bounds = array<i64: 2, 1, 1>, scalar_prefetch = 0 : i64, scratch_operands = 0 : i64, tpu.core_type = #tpu.core_type<tc>, window_params = [{transform_indices = @transform_0, window_bounds = array<i64: 2>}, {transform_indices = @transform_1, window_bounds = array<i64: 2>}, {transform_indices = @transform_2, window_bounds = array<i64: 8>}, {transform_indices = @transform_3, window_bounds = array<i64: 4, 4>}, {transform_indices = @transform_4, window_bounds = array<i64: 1, 4, 16, 128>}, {transform_indices = @transform_5, window_bounds = array<i64: 1, 4, 16, 128>}, {transform_indices = @transform_6, window_bounds = array<i64: 1, 8, 128>}, {transform_indices = @transform_7, window_bounds = array<i64: 1, 8, 128>}]} {
    %c0_i32 = arith.constant 0 : i32
    %0 = arith.cmpi eq, %arg2, %c0_i32 : i32
    %1 = arith.extui %0 : i1 to i32
    %c0_i32_0 = arith.constant 0 : i32
    %2 = arith.cmpi ne, %1, %c0_i32_0 : i32
    scf.if %2 {
      %cst_55 = arith.constant 0.000000e+00 : f32
      %180 = vector.broadcast %cst_55 : f32 to vector<8x128xf32>
      %c0_56 = arith.constant 0 : index
      %c0_57 = arith.constant 0 : index
      %c0_58 = arith.constant 0 : index
      %181 = vector.load %arg9[%c0_56, %c0_57, %c0_58] : memref<1x8x128xf32, #tpu.memory_space<vmem>>, vector<1x8x128xf32>
      %182 = vector.shape_cast %181 : vector<1x8x128xf32> to vector<8x128xf32>
      %183 = vector.shape_cast %180 : vector<8x128xf32> to vector<1x8x128xf32>
      tpu.vector_store %arg9[%c0_56, %c0_57, %c0_58], %183 {strides = array<i32>} : memref<1x8x128xf32, #tpu.memory_space<vmem>>, vector<1x8x128xf32>,
      %cst_59 = arith.constant 0.000000e+00 : f32
      %184 = vector.broadcast %cst_59 : f32 to vector<8x128xf32>
      %c0_60 = arith.constant 0 : index
      %c0_61 = arith.constant 0 : index
      %c0_62 = arith.constant 0 : index
      %185 = vector.load %arg10[%c0_60, %c0_61, %c0_62] : memref<1x8x128xf32, #tpu.memory_space<vmem>>, vector<1x8x128xf32>
      %186 = vector.shape_cast %185 : vector<1x8x128xf32> to vector<8x128xf32>
      %187 = vector.shape_cast %184 : vector<8x128xf32> to vector<1x8x128xf32>
      tpu.vector_store %arg10[%c0_60, %c0_61, %c0_62], %187 {strides = array<i32>} : memref<1x8x128xf32, #tpu.memory_space<vmem>>, vector<1x8x128xf32>,
    } else {
    }
    %3 = arith.index_cast %arg0 : i32 to index
    %4 = memref.load %arg3[%3] : memref<2xf32, #tpu.memory_space<smem>>
    %5 = arith.index_cast %arg0 : i32 to index
    %6 = memref.load %arg4[%5] : memref<2xf32, #tpu.memory_space<smem>>
    %c4_i32 = arith.constant 4 : i32
    %7 = arith.muli %arg0, %c4_i32 : i32
    %c0_i32_1 = arith.constant 0 : i32
    %8 = arith.addi %7, %c0_i32_1 : i32
    %9 = arith.index_cast %8 : i32 to index
    %10 = memref.load %arg5[%9] : memref<8xf32, #tpu.memory_space<smem>>
    %c4_i32_2 = arith.constant 4 : i32
    %11 = arith.muli %arg0, %c4_i32_2 : i32
    %c1_i32 = arith.constant 1 : i32
    %12 = arith.addi %11, %c1_i32 : i32
    %13 = arith.index_cast %12 : i32 to index
    %14 = memref.load %arg5[%13] : memref<8xf32, #tpu.memory_space<smem>>
    %c4_i32_3 = arith.constant 4 : i32
    %15 = arith.muli %arg0, %c4_i32_3 : i32
    %c2_i32 = arith.constant 2 : i32
    %16 = arith.addi %15, %c2_i32 : i32
    %17 = arith.index_cast %16 : i32 to index
    %18 = memref.load %arg5[%17] : memref<8xf32, #tpu.memory_space<smem>>
    %c4_i32_4 = arith.constant 4 : i32
    %19 = arith.muli %arg0, %c4_i32_4 : i32
    %c3_i32 = arith.constant 3 : i32
    %20 = arith.addi %19, %c3_i32 : i32
    %21 = arith.index_cast %20 : i32 to index
    %22 = memref.load %arg5[%21] : memref<8xf32, #tpu.memory_space<smem>>
    %cst = arith.constant 0.000000e+00 : f32
    %23 = vector.broadcast %cst : f32 to vector<16x128xf32>
    %c0_i32_5 = arith.constant 0 : i32
    %c16_i32 = arith.constant 16 : i32
    %24 = arith.muli %c0_i32_5, %c16_i32 : i32
    %25 = tpu.assume_multiple %24, 16 : i32
    %c0 = arith.constant 0 : index
    %c0_6 = arith.constant 0 : index
    %26 = arith.index_cast %25 : i32 to index
    %c0_7 = arith.constant 0 : index
    %27 = vector.load %arg7[%c0, %c0_6, %26, %c0_7] : memref<1x4x16x128xf32, #tpu.memory_space<vmem>>, vector<1x4x16x128xf32>
    %28 = vector.shape_cast %27 : vector<1x4x16x128xf32> to vector<4x16x128xf32>
    %c0_8 = arith.constant 0 : index
    %c0_9 = arith.constant 0 : index
    %29 = arith.index_cast %25 : i32 to index
    %c0_10 = arith.constant 0 : index
    %30 = vector.load %arg8[%c0_8, %c0_9, %29, %c0_10] : memref<1x4x16x128xf32, #tpu.memory_space<vmem>>, vector<1x4x16x128xf32>
    %31 = vector.shape_cast %30 : vector<1x4x16x128xf32> to vector<4x16x128xf32>
    %32 = vector.extract_strided_slice %28 {offsets = [0, 0, 0], sizes = [1, 16, 128], strides = [1, 1, 1]} : vector<4x16x128xf32> to vector<1x16x128xf32>
    %33 = vector.shape_cast %32 : vector<1x16x128xf32> to vector<16x128xf32>
    %34 = vector.broadcast %4 : f32 to vector<16x128xf32>
    %35 = arith.mulf %34, %33 : vector<16x128xf32>
    %36 = vector.extract_strided_slice %31 {offsets = [0, 0, 0], sizes = [1, 16, 128], strides = [1, 1, 1]} : vector<4x16x128xf32> to vector<1x16x128xf32>
    %37 = vector.shape_cast %36 : vector<1x16x128xf32> to vector<16x128xf32>
    %38 = vector.broadcast %6 : f32 to vector<16x128xf32>
    %39 = arith.mulf %38, %37 : vector<16x128xf32>
    %40 = arith.addf %35, %39 : vector<16x128xf32>
    %41 = vector.extract_strided_slice %28 {offsets = [1, 0, 0], sizes = [1, 16, 128], strides = [1, 1, 1]} : vector<4x16x128xf32> to vector<1x16x128xf32>
    %42 = vector.shape_cast %41 : vector<1x16x128xf32> to vector<16x128xf32>
    %43 = vector.broadcast %4 : f32 to vector<16x128xf32>
    %44 = arith.mulf %43, %42 : vector<16x128xf32>
    %45 = vector.extract_strided_slice %31 {offsets = [1, 0, 0], sizes = [1, 16, 128], strides = [1, 1, 1]} : vector<4x16x128xf32> to vector<1x16x128xf32>
    %46 = vector.shape_cast %45 : vector<1x16x128xf32> to vector<16x128xf32>
    %47 = vector.broadcast %6 : f32 to vector<16x128xf32>
    %48 = arith.mulf %47, %46 : vector<16x128xf32>
    %49 = arith.addf %44, %48 : vector<16x128xf32>
    %50 = vector.extract_strided_slice %28 {offsets = [2, 0, 0], sizes = [1, 16, 128], strides = [1, 1, 1]} : vector<4x16x128xf32> to vector<1x16x128xf32>
    %51 = vector.shape_cast %50 : vector<1x16x128xf32> to vector<16x128xf32>
    %52 = vector.broadcast %4 : f32 to vector<16x128xf32>
    %53 = arith.mulf %52, %51 : vector<16x128xf32>
    %54 = vector.extract_strided_slice %31 {offsets = [2, 0, 0], sizes = [1, 16, 128], strides = [1, 1, 1]} : vector<4x16x128xf32> to vector<1x16x128xf32>
    %55 = vector.shape_cast %54 : vector<1x16x128xf32> to vector<16x128xf32>
    %56 = vector.broadcast %6 : f32 to vector<16x128xf32>
    %57 = arith.mulf %56, %55 : vector<16x128xf32>
    %58 = arith.addf %53, %57 : vector<16x128xf32>
    %59 = vector.extract_strided_slice %28 {offsets = [3, 0, 0], sizes = [1, 16, 128], strides = [1, 1, 1]} : vector<4x16x128xf32> to vector<1x16x128xf32>
    %60 = vector.shape_cast %59 : vector<1x16x128xf32> to vector<16x128xf32>
    %61 = vector.broadcast %4 : f32 to vector<16x128xf32>
    %62 = arith.mulf %61, %60 : vector<16x128xf32>
    %63 = vector.extract_strided_slice %31 {offsets = [3, 0, 0], sizes = [1, 16, 128], strides = [1, 1, 1]} : vector<4x16x128xf32> to vector<1x16x128xf32>
    %64 = vector.shape_cast %63 : vector<1x16x128xf32> to vector<16x128xf32>
    %65 = vector.broadcast %6 : f32 to vector<16x128xf32>
    %66 = arith.mulf %65, %64 : vector<16x128xf32>
    %67 = arith.addf %62, %66 : vector<16x128xf32>
    %c0_11 = arith.constant 0 : index
    %c0_12 = arith.constant 0 : index
    %68 = memref.load %arg6[%c0_11, %c0_12] : memref<4x4xf32, #tpu.memory_space<smem>>
    %69 = vector.broadcast %68 : f32 to vector<16x128xf32>
    %70 = arith.mulf %69, %40 : vector<16x128xf32>
    %c0_13 = arith.constant 0 : index
    %c1 = arith.constant 1 : index
    %71 = memref.load %arg6[%c0_13, %c1] : memref<4x4xf32, #tpu.memory_space<smem>>
    %72 = vector.broadcast %71 : f32 to vector<16x128xf32>
    %73 = arith.mulf %72, %49 : vector<16x128xf32>
    %74 = arith.addf %70, %73 : vector<16x128xf32>
    %c0_14 = arith.constant 0 : index
    %c2 = arith.constant 2 : index
    %75 = memref.load %arg6[%c0_14, %c2] : memref<4x4xf32, #tpu.memory_space<smem>>
    %76 = vector.broadcast %75 : f32 to vector<16x128xf32>
    %77 = arith.mulf %76, %58 : vector<16x128xf32>
    %78 = arith.addf %74, %77 : vector<16x128xf32>
    %c0_15 = arith.constant 0 : index
    %c3 = arith.constant 3 : index
    %79 = memref.load %arg6[%c0_15, %c3] : memref<4x4xf32, #tpu.memory_space<smem>>
    %80 = vector.broadcast %79 : f32 to vector<16x128xf32>
    %81 = arith.mulf %80, %67 : vector<16x128xf32>
    %82 = arith.addf %78, %81 : vector<16x128xf32>
    %83 = vector.extract_strided_slice %31 {offsets = [0, 0, 0], sizes = [1, 16, 128], strides = [1, 1, 1]} : vector<4x16x128xf32> to vector<1x16x128xf32>
    %84 = vector.shape_cast %83 : vector<1x16x128xf32> to vector<16x128xf32>
    %85 = arith.subf %84, %82 : vector<16x128xf32>
    %86 = vector.broadcast %10 : f32 to vector<16x128xf32>
    %87 = arith.subf %85, %86 : vector<16x128xf32>
    %88 = math.absf %87 : vector<16x128xf32>
    %89 = arith.addf %23, %88 : vector<16x128xf32>
    %90 = arith.mulf %87, %87 : vector<16x128xf32>
    %91 = arith.addf %23, %90 : vector<16x128xf32>
    %c1_16 = arith.constant 1 : index
    %c0_17 = arith.constant 0 : index
    %92 = memref.load %arg6[%c1_16, %c0_17] : memref<4x4xf32, #tpu.memory_space<smem>>
    %93 = vector.broadcast %92 : f32 to vector<16x128xf32>
    %94 = arith.mulf %93, %40 : vector<16x128xf32>
    %c1_18 = arith.constant 1 : index
    %c1_19 = arith.constant 1 : index
    %95 = memref.load %arg6[%c1_18, %c1_19] : memref<4x4xf32, #tpu.memory_space<smem>>
    %96 = vector.broadcast %95 : f32 to vector<16x128xf32>
    %97 = arith.mulf %96, %49 : vector<16x128xf32>
    %98 = arith.addf %94, %97 : vector<16x128xf32>
    %c1_20 = arith.constant 1 : index
    %c2_21 = arith.constant 2 : index
    %99 = memref.load %arg6[%c1_20, %c2_21] : memref<4x4xf32, #tpu.memory_space<smem>>
    %100 = vector.broadcast %99 : f32 to vector<16x128xf32>
    %101 = arith.mulf %100, %58 : vector<16x128xf32>
    %102 = arith.addf %98, %101 : vector<16x128xf32>
    %c1_22 = arith.constant 1 : index
    %c3_23 = arith.constant 3 : index
    %103 = memref.load %arg6[%c1_22, %c3_23] : memref<4x4xf32, #tpu.memory_space<smem>>
    %104 = vector.broadcast %103 : f32 to vector<16x128xf32>
    %105 = arith.mulf %104, %67 : vector<16x128xf32>
    %106 = arith.addf %102, %105 : vector<16x128xf32>
    %107 = vector.extract_strided_slice %31 {offsets = [1, 0, 0], sizes = [1, 16, 128], strides = [1, 1, 1]} : vector<4x16x128xf32> to vector<1x16x128xf32>
    %108 = vector.shape_cast %107 : vector<1x16x128xf32> to vector<16x128xf32>
    %109 = arith.subf %108, %106 : vector<16x128xf32>
    %110 = vector.broadcast %14 : f32 to vector<16x128xf32>
    %111 = arith.subf %109, %110 : vector<16x128xf32>
    %112 = math.absf %111 : vector<16x128xf32>
    %113 = arith.addf %89, %112 : vector<16x128xf32>
    %114 = arith.mulf %111, %111 : vector<16x128xf32>
    %115 = arith.addf %91, %114 : vector<16x128xf32>
    %c2_24 = arith.constant 2 : index
    %c0_25 = arith.constant 0 : index
    %116 = memref.load %arg6[%c2_24, %c0_25] : memref<4x4xf32, #tpu.memory_space<smem>>
    %117 = vector.broadcast %116 : f32 to vector<16x128xf32>
    %118 = arith.mulf %117, %40 : vector<16x128xf32>
    %c2_26 = arith.constant 2 : index
    %c1_27 = arith.constant 1 : index
    %119 = memref.load %arg6[%c2_26, %c1_27] : memref<4x4xf32, #tpu.memory_space<smem>>
    %120 = vector.broadcast %119 : f32 to vector<16x128xf32>
    %121 = arith.mulf %120, %49 : vector<16x128xf32>
    %122 = arith.addf %118, %121 : vector<16x128xf32>
    %c2_28 = arith.constant 2 : index
    %c2_29 = arith.constant 2 : index
    %123 = memref.load %arg6[%c2_28, %c2_29] : memref<4x4xf32, #tpu.memory_space<smem>>
    %124 = vector.broadcast %123 : f32 to vector<16x128xf32>
    %125 = arith.mulf %124, %58 : vector<16x128xf32>
    %126 = arith.addf %122, %125 : vector<16x128xf32>
    %c2_30 = arith.constant 2 : index
    %c3_31 = arith.constant 3 : index
    %127 = memref.load %arg6[%c2_30, %c3_31] : memref<4x4xf32, #tpu.memory_space<smem>>
    %128 = vector.broadcast %127 : f32 to vector<16x128xf32>
    %129 = arith.mulf %128, %67 : vector<16x128xf32>
    %130 = arith.addf %126, %129 : vector<16x128xf32>
    %131 = vector.extract_strided_slice %31 {offsets = [2, 0, 0], sizes = [1, 16, 128], strides = [1, 1, 1]} : vector<4x16x128xf32> to vector<1x16x128xf32>
    %132 = vector.shape_cast %131 : vector<1x16x128xf32> to vector<16x128xf32>
    %133 = arith.subf %132, %130 : vector<16x128xf32>
    %134 = vector.broadcast %18 : f32 to vector<16x128xf32>
    %135 = arith.subf %133, %134 : vector<16x128xf32>
    %136 = math.absf %135 : vector<16x128xf32>
    %137 = arith.addf %113, %136 : vector<16x128xf32>
    %138 = arith.mulf %135, %135 : vector<16x128xf32>
    %139 = arith.addf %115, %138 : vector<16x128xf32>
    %c3_32 = arith.constant 3 : index
    %c0_33 = arith.constant 0 : index
    %140 = memref.load %arg6[%c3_32, %c0_33] : memref<4x4xf32, #tpu.memory_space<smem>>
    %141 = vector.broadcast %140 : f32 to vector<16x128xf32>
    %142 = arith.mulf %141, %40 : vector<16x128xf32>
    %c3_34 = arith.constant 3 : index
    %c1_35 = arith.constant 1 : index
    %143 = memref.load %arg6[%c3_34, %c1_35] : memref<4x4xf32, #tpu.memory_space<smem>>
    %144 = vector.broadcast %143 : f32 to vector<16x128xf32>
    %145 = arith.mulf %144, %49 : vector<16x128xf32>
    %146 = arith.addf %142, %145 : vector<16x128xf32>
    %c3_36 = arith.constant 3 : index
    %c2_37 = arith.constant 2 : index
    %147 = memref.load %arg6[%c3_36, %c2_37] : memref<4x4xf32, #tpu.memory_space<smem>>
    %148 = vector.broadcast %147 : f32 to vector<16x128xf32>
    %149 = arith.mulf %148, %58 : vector<16x128xf32>
    %150 = arith.addf %146, %149 : vector<16x128xf32>
    %c3_38 = arith.constant 3 : index
    %c3_39 = arith.constant 3 : index
    %151 = memref.load %arg6[%c3_38, %c3_39] : memref<4x4xf32, #tpu.memory_space<smem>>
    %152 = vector.broadcast %151 : f32 to vector<16x128xf32>
    %153 = arith.mulf %152, %67 : vector<16x128xf32>
    %154 = arith.addf %150, %153 : vector<16x128xf32>
    %155 = vector.extract_strided_slice %31 {offsets = [3, 0, 0], sizes = [1, 16, 128], strides = [1, 1, 1]} : vector<4x16x128xf32> to vector<1x16x128xf32>
    %156 = vector.shape_cast %155 : vector<1x16x128xf32> to vector<16x128xf32>
    %157 = arith.subf %156, %154 : vector<16x128xf32>
    %158 = vector.broadcast %22 : f32 to vector<16x128xf32>
    %159 = arith.subf %157, %158 : vector<16x128xf32>
    %160 = math.absf %159 : vector<16x128xf32>
    %161 = arith.addf %137, %160 : vector<16x128xf32>
    %162 = arith.mulf %159, %159 : vector<16x128xf32>
    %163 = arith.addf %139, %162 : vector<16x128xf32>
    %c1_i32_40 = arith.constant 1 : i32
    %164 = vector.shape_cast %161 : vector<16x128xf32> to vector<2x8x128xf32>
    %cst_41 = arith.constant dense<0.000000e+00> : vector<8x128xf32>
    %165 = vector.multi_reduction <add>, %164, %cst_41 [0] : vector<2x8x128xf32> to vector<8x128xf32>
    %166 = vector.shape_cast %163 : vector<16x128xf32> to vector<2x8x128xf32>
    %cst_42 = arith.constant dense<0.000000e+00> : vector<8x128xf32>
    %167 = vector.multi_reduction <add>, %166, %cst_42 [0] : vector<2x8x128xf32> to vector<8x128xf32>
    %c0_43 = arith.constant 0 : index
    %c0_44 = arith.constant 0 : index
    %c0_45 = arith.constant 0 : index
    %168 = vector.load %arg9[%c0_43, %c0_44, %c0_45] : memref<1x8x128xf32, #tpu.memory_space<vmem>>, vector<1x8x128xf32>
    %169 = vector.shape_cast %168 : vector<1x8x128xf32> to vector<8x128xf32>
    %170 = arith.addf %169, %165 : vector<8x128xf32>
    %c0_46 = arith.constant 0 : index
    %c0_47 = arith.constant 0 : index
    %c0_48 = arith.constant 0 : index
    %171 = vector.load %arg9[%c0_46, %c0_47, %c0_48] : memref<1x8x128xf32, #tpu.memory_space<vmem>>, vector<1x8x128xf32>
    %172 = vector.shape_cast %171 : vector<1x8x128xf32> to vector<8x128xf32>
    %173 = vector.shape_cast %170 : vector<8x128xf32> to vector<1x8x128xf32>
    tpu.vector_store %arg9[%c0_46, %c0_47, %c0_48], %173 {strides = array<i32>} : memref<1x8x128xf32, #tpu.memory_space<vmem>>, vector<1x8x128xf32>,
    %c0_49 = arith.constant 0 : index
    %c0_50 = arith.constant 0 : index
    %c0_51 = arith.constant 0 : index
    %174 = vector.load %arg10[%c0_49, %c0_50, %c0_51] : memref<1x8x128xf32, #tpu.memory_space<vmem>>, vector<1x8x128xf32>
    %175 = vector.shape_cast %174 : vector<1x8x128xf32> to vector<8x128xf32>
    %176 = arith.addf %175, %167 : vector<8x128xf32>
    %c0_52 = arith.constant 0 : index
    %c0_53 = arith.constant 0 : index
    %c0_54 = arith.constant 0 : index
    %177 = vector.load %arg10[%c0_52, %c0_53, %c0_54] : memref<1x8x128xf32, #tpu.memory_space<vmem>>, vector<1x8x128xf32>
    %178 = vector.shape_cast %177 : vector<1x8x128xf32> to vector<8x128xf32>
    %179 = vector.shape_cast %176 : vector<8x128xf32> to vector<1x8x128xf32>
    tpu.vector_store %arg10[%c0_52, %c0_53, %c0_54], %179 {strides = array<i32>} : memref<1x8x128xf32, #tpu.memory_space<vmem>>, vector<1x8x128xf32>,
    return
  }
  func.func @transform_0(%arg0: i32, %arg1: i32, %arg2: i32) -> i32 {
    %c0_i32 = arith.constant 0 : i32
    %c0_i32_0 = arith.constant 0 : i32
    return %c0_i32 : i32
  }
  func.func @transform_1(%arg0: i32, %arg1: i32, %arg2: i32) -> i32 {
    %c0_i32 = arith.constant 0 : i32
    %c0_i32_0 = arith.constant 0 : i32
    return %c0_i32 : i32
  }
  func.func @transform_2(%arg0: i32, %arg1: i32, %arg2: i32) -> i32 {
    %c0_i32 = arith.constant 0 : i32
    %c0_i32_0 = arith.constant 0 : i32
    return %c0_i32 : i32
  }
  func.func @transform_3(%arg0: i32, %arg1: i32, %arg2: i32) -> (i32, i32) {
    %c0_i32 = arith.constant 0 : i32
    %c0_i32_0 = arith.constant 0 : i32
    %c0_i32_1 = arith.constant 0 : i32
    return %c0_i32, %c0_i32_0 : i32, i32
  }
  func.func @transform_4(%arg0: i32, %arg1: i32, %arg2: i32) -> (i32, i32, i32, i32) {
    %c1_i32 = arith.constant 1 : i32
    %0 = arith.muli %arg1, %c1_i32 : i32
    %1 = arith.addi %0, %arg2 : i32
    %c0_i32 = arith.constant 0 : i32
    %c0_i32_0 = arith.constant 0 : i32
    %c0_i32_1 = arith.constant 0 : i32
    return %arg0, %c0_i32, %1, %c0_i32_0 : i32, i32, i32, i32
  }
  func.func @transform_5(%arg0: i32, %arg1: i32, %arg2: i32) -> (i32, i32, i32, i32) {
    %c1_i32 = arith.constant 1 : i32
    %0 = arith.muli %arg1, %c1_i32 : i32
    %1 = arith.addi %0, %arg2 : i32
    %c0_i32 = arith.constant 0 : i32
    %c0_i32_0 = arith.constant 0 : i32
    %c0_i32_1 = arith.constant 0 : i32
    return %arg0, %c0_i32, %1, %c0_i32_0 : i32, i32, i32, i32
  }
  func.func @transform_6(%arg0: i32, %arg1: i32, %arg2: i32) -> (i32, i32, i32) {
    %c1_i32 = arith.constant 1 : i32
    %0 = arith.muli %arg0, %c1_i32 : i32
    %1 = arith.addi %0, %arg1 : i32
    %c0_i32 = arith.constant 0 : i32
    %c0_i32_0 = arith.constant 0 : i32
    %c0_i32_1 = arith.constant 0 : i32
    return %1, %c0_i32, %c0_i32_0 : i32, i32, i32
  }
  func.func @transform_7(%arg0: i32, %arg1: i32, %arg2: i32) -> (i32, i32, i32) {
    %c1_i32 = arith.constant 1 : i32
    %0 = arith.muli %arg0, %c1_i32 : i32
    %1 = arith.addi %0, %arg1 : i32
    %c0_i32 = arith.constant 0 : i32
    %c0_i32_0 = arith.constant 0 : i32
    %c0_i32_1 = arith.constant 0 : i32
    return %1, %c0_i32, %c0_i32_0 : i32, i32, i32
  }
}

</mosaic_0001>

<bundles_post_ra>
// kernel: tpu_custom_call.1
= control target key start
LH: loop header
LB: loop body
LE: loop exit
PB: predicated region body
PF: predicated region fallthrough
CT: control target
= control target key end

     0   :  { %s1836_s0 = inlined_call_operand.hbm [shape: f32[2], index: 0, kind: input, shape index: {}]   ;;  %s1837_s1 = inlined_call_operand.vmem [shape: f32[2], index: 1, kind: input, shape index: {}]   ;;  %s1838_s2 = inlined_call_operand.vmem [shape: f32[8], index: 2, kind: input, shape index: {}]   ;;  %s1839_s3 = inlined_call_operand.vmem [shape: f32[4,4], index: 3, kind: input, shape index: {}]   ;;  %s1840_s4 = inlined_call_operand.hbm [shape: f32[2,4,16,128], index: 4, kind: input, shape index: {}]   ;;  %s1841_s5 = inlined_call_operand.hbm [shape: f32[2,4,16,128], index: 5, kind: input, shape index: {}]   ;;  %s1842_s6 = inlined_call_operand.hbm [shape: f32[2,8,128], index: 6, kind: output, shape index: {0}]   ;;  %s1843_s7 = inlined_call_operand.hbm [shape: f32[2,8,128], index: 7, kind: output, shape index: {1}]  }
   0x1   :  { %1851 = sst [smem:[#allocation25_spill]] %s1836_s0 }
   0x2   :  { %1852 = sst [smem:[#allocation26_spill]] %s1837_s1 }
   0x3   :  { %1853 = sst [smem:[#allocation27_spill]] %s1838_s2 }
   0x4   :  { %1854 = sst [smem:[#allocation28_spill]] %s1839_s3 }
   0x5   :  { %1855 = sst [smem:[#allocation29_spill]] %s1840_s4 }
   0x6   :  { %13 = vsyncpa [#allocation5], 0 }
   0x7   :  { %14 = vsyncpa [#allocation6], 0 }
   0x8   :  { %15 = vsyncpa [#allocation9], 0 }
   0x9   :  { %16 = vsyncpa [#allocation3], 0 }
   0xa   :  { %18 = vsyncpa [#allocation3 + $0x1], 0 }
   0xb   :  { %19 = vsyncpa [#allocation13], 0 }
   0xc   :  { %21 = vsyncpa [#allocation13 + $0x1], 0 }
   0xd   :  { %22 = vsyncpa [#allocation4], 0 }
   0xe   :  { %24 = vsyncpa [#allocation4 + $0x1], 0 }
   0xf   :  { %25 = vsyncpa [#allocation16], 0 }
  0x10   :  { %27 = vsyncpa [#allocation16 + $0x1], 0  ;;  %s1333_s24 = smov 0   ;;  %s1335_s25 = smov 0  }
  0x11   :  { %s1337_s26 = smov 0   ;;  %s1339_s27 = smov 0  }
  0x12   :  { %s1341_s28 = smov 0   ;;  %s1343_s29 = smov 0  }
  0x13 LB: > { %s870_s30 = sadd.s32 4294967295, %s1281_s29   ;;  %s871_s8 = sadd.s32 4294967294, %s1281_s29   ;;  %s1281_s29 = sphi %s1343_s29, %s33_s29   ;;  %s1277_s28 = sphi %s1341_s28, %s1884_s28   ;;  %s1273_s27 = sphi %s1339_s27, %s1883_s27   ;;  %s1269_s26 = sphi %s1337_s26, %s1882_s26   ;;  %s1265_s25 = sphi %s1335_s25, %s1881_s25   ;;  %s1261_s24 = sphi %s1333_s24, %s1880_s24  }
  0x14   : > { %p160_p0 = scmp.ne.s32.totalorder %s1265_s25, %s1261_s24  ;;  %p1367_p1 = scmp.eq.s32.totalorder %s870_s30, 0 }
  0x15   : > { %p1371_p2 = scmp.eq.s32.totalorder %s870_s30, 1  ;;  %p222_p3 = scmp.eq.s32.totalorder %s871_s8, 1 }
  0x16   : > { %s1856_s9 = scalar_select %p1367_p1, 1, 0 }
  0x17   : > { %p1377_p4 = por %p1367_p1, %p160_p0  ;;  %p872_p5 = scmp.ge.s32.totalorder %s1281_s29, 1 }
  0x18   : > { %p1382_p6 = por %p222_p3, %p160_p0  ;;  %p257_p7 = scmp.lt.s32.totalorder %s1281_s29, 3 }
  0x19   : > { %s1858_s11 = scalar_select %p1377_p4, 1, 0 }
  0x1a   : > { %s1859_s12 = scalar_select %p1382_p6, 1, 0 }
  0x1b   : > { %s1860_s2 = sld [smem:[#allocation27_spill]]  ;;  %p1390_p8 = pnand %p872_p5, %p257_p7 }
  0x1c   : > { %s1863_s1 = sld [smem:[#allocation26_spill]]  ;;  %s1864_s3 = sld [smem:[#allocation28_spill]] }
  0x1d   : > { %p941_p10 = pneg %p1390_p8 }
  0x1f   : > { %p1399_p11 = pnand %p941_p10, %p1367_p1 }
  0x21   : > { %s290_s15 = sshll.u32 %s1860_s2, 4  ;;  %p1035_p13 = pneg %p1399_p11  ;;  %s291_s15 = int_to_ptr.vmem [resolvable:$true] %s290_s15 }
  0x22   : > { %s279_s20 = sshll.u32 %s1863_s1, 4  ;;  %s1033_s30 = scalar_lea.vmem %s291_s15, 16  ;;  %s1406_s20 = int_to_ptr.vmem [resolvable:$true] %s279_s20 }
  0x23   : > { %p1034_p12 = scmp.ne.s32.totalorder %s291_s15, %s1033_s30  ;;  %p1041_p5 = scmp.lt.s32.totalorder %s291_s15, %s291_s15 }
  0x24   : > { %p1042_p7 = scmp.lt.s32.totalorder %s1033_s30, %s1033_s30 }
  0x25   : > { %p1036_p0 = pnand %p1035_p13, %p1034_p12 }
  0x26   : > { %p1043_p10 = por %p1042_p7, %p1041_p5 }
  0x27   : > { %p1037_p3 = pneg %p1036_p0 }
  0x29   : > { %p1044_p9 = pnand %p1043_p10, %p1037_p3 }
  0x2b   : > { %1047 = shalt.err (!%p1044_p9)
}
  0x2c   : > { %s1283_s8 = smov [#allocation8]   ;;  %s1865_s0 = sld [smem:[#allocation25_spill]] }
  0x2d   : > { %950 = dma.vmem_to_smem (!%p1399_p11), %s291_s15, 16, %s1283_s8, [#allocation9]  }
  0x32   : > { %s1048_s18 = scalar_lea.hbm %s1865_s0, 16 }
  0x33   : > { %p1049_p6 = scmp.ne.s32.totalorder %s1865_s0, %s1048_s18  ;;  %p1055_p9 = scmp.lt.u32.totalorder %s1048_s18, %s1865_s0 }
  0x35   : > { %p1051_p12 = pnand %p1049_p6, %p1035_p13 }
  0x37   : > { %p1052_p0 = pneg %p1051_p12 }
  0x39   : > { %p1057_p3 = pnand %p1055_p9, %p1052_p0 }
  0x3b   : > { %1060 = shalt.err (!%p1057_p3)
}
  0x3c   : > { %s1284_s23 = smov [#allocation2]   ;;  %s1061_s13 = scalar_lea.vmem %s1406_s20, 16 }
  0x3d   : > { %944 = dma.hbm_to_smem (!%p1399_p11), %s1865_s0, 16, %s1284_s23, [#allocation5]  }
  0x3e   : > { %p1062_p6 = scmp.ne.s32.totalorder %s1406_s20, %s1061_s13  ;;  %p1069_p10 = scmp.lt.s32.totalorder %s1406_s20, %s1406_s20 }
  0x3f   : > { %p1070_p12 = scmp.lt.s32.totalorder %s1061_s13, %s1061_s13 }
  0x40   : > { %p1064_p5 = pnand %p1062_p6, %p1035_p13 }
  0x41   : > { %p1071_p0 = por %p1070_p12, %p1069_p10 }
  0x42   : > { %p1065_p7 = pneg %p1064_p5 }
  0x44   : > { %p1072_p9 = pnand %p1071_p0, %p1065_p7 }
  0x46   : > { %1075 = shalt.err (!%p1072_p9)
}
  0x47   : > { %s1285_s14 = smov [#allocation7]   ;;  %s1866_s19 = sshll.u32 %s1864_s3, 4  ;;  %s302_s19 = int_to_ptr.vmem [resolvable:$true] %s1866_s19 }
  0x48   : > { %947 = dma.vmem_to_smem (!%p1399_p11), %s1406_s20, 16, %s1285_s14, [#allocation6]  }
  0x49   : > { %s1076_s21 = scalar_lea.vmem %s302_s19, 64  ;;  %p1084_p10 = scmp.lt.s32.totalorder %s302_s19, %s302_s19 }
  0x4a   : > { %p1077_p3 = scmp.ne.s32.totalorder %s302_s19, %s1076_s21  ;;  %p1085_p7 = scmp.lt.s32.totalorder %s1076_s21, %s1076_s21 }
  0x4c   : > { %p1079_p6 = pnand %p1077_p3, %p1035_p13  ;;  %p1086_p12 = por %p1085_p7, %p1084_p10 }
  0x4e   : > { %p1080_p5 = pneg %p1079_p6 }
  0x50   : > { %p1087_p0 = pnand %p1086_p12, %p1080_p5 }
  0x52   : > { %1090 = shalt.err (!%p1087_p0)
}
  0x53   : > { %s1286_s22 = smov [#allocation10]   ;;  %s52_s20 = sadd.s32 1, %s1277_s28 }
  0x54   : > { %953 = dma.vmem_to_smem (!%p1399_p11), %s302_s19, 64, %s1286_s22, [#allocation9]  }
  0x55   : > { %s147_s30 = sadd.s32 1, %s1269_s26  ;;  %p54_p13 = scmp.ge.s32.totalorder %s52_s20, 2 }
  0x56   : > { %p154_p9 = scmp.ne.s32.totalorder %s1269_s26, %s1265_s25  ;;  %p155_p3 = scmp.eq.s32.totalorder %s1281_s29, 0 }
  0x57   : > { %p972_p6 = scmp.lt.s32.totalorder %s1281_s29, 2  ;;  %s1886_s20 = smov (%p54_p13, %s52_s20), 0 }
  0x58   : > { %1867 = sst [smem:[#allocation24_spill]] %s1886_s20  ;;  %p156_p5 = por %p155_p3, %p154_p9 }
  0x59   : > { %p1464_p10 = por %p1371_p2, %p154_p9  ;;  %s142_s15 = ssub.s32 %s1277_s28, %s1886_s20 }
  0x5a   : > { %s1471_s8 = sand.u32 1, %s1269_s26   ;;  %p145_p11 = scmp.eq.s32.totalorder %s142_s15, 0 }
  0x5b   : > { %s1868_s17 = scalar_select %p1464_p10, 1, 0 }
  0x5c   : > { %s1844_s13 = sshll.u32 %s1471_s8, 6  ;;  %s1845_s14 = sshll.u32 %s1277_s28, 10 }
  0x5d   : > { %s1476_s18 = scalar_select %p145_p11, %s1269_s26, %s147_s30  }
  0x5e   : > { %s1869_s4 = sld [smem:[#allocation29_spill]]  ;;  %s316_s21 = scalar_lea.vmem [#allocation11], %s1844_s13 }
  0x5f   : > { %s326_s22 = sshll.u32 %s316_s21, 4  ;;  %p1489_p2 = pnand %p972_p6, %p156_p5  ;;  %s1493_s22 = int_to_ptr.vmem [resolvable:$true] %s326_s22 }
  0x61   : > { %p1093_p12 = pneg %p1489_p2 }
  0x64   : > { %s1483_s10 = scalar_lea.hbm %s1869_s4, %s1845_s14  ;;  %s1096_s13 = scalar_lea.hbm %s1869_s4, 2048 }
  0x65   : > { %s1091_s23 = scalar_lea.hbm %s1483_s10, 1024  ;;  %p1097_p9 = scmp.lt.u32.totalorder %s1483_s10, %s1869_s4 }
  0x66   : > { %p1092_p7 = scmp.ne.s32.totalorder %s1483_s10, %s1091_s23  ;;  %p1098_p3 = scmp.lt.u32.totalorder %s1096_s13, %s1091_s23 }
  0x67   : > { %p1100_p5 = scmp.lt.u32.totalorder %s1091_s23, %s1483_s10 }
  0x68   : > { %p1094_p0 = pnand %p1093_p12, %p1092_p7  ;;  %p1099_p6 = por %p1098_p3, %p1097_p9 }
  0x6a   : > { %p1095_p13 = pneg %p1094_p0  ;;  %p1101_p11 = por %p1100_p5, %p1099_p6 }
  0x6c   : > { %p1102_p10 = pnand %p1101_p11, %p1095_p13 }
  0x6e   : > { %1105 = shalt.err (!%p1102_p10)
}
  0x6f   : > { %s1106_s30 = scalar_lea.vmem %s1493_s22, 1024  ;;  %s1287_s19 = smov [#allocation11]  }
  0x70   : > { %p1107_p7 = scmp.ne.s32.totalorder %s1493_s22, %s1106_s30  ;;  %s1111_s21 = sshll.u32 %s1287_s19, 4  ;;  %s1112_s21 = int_to_ptr.vmem [resolvable:$false] %s1111_s21 }
  0x71   : > { %s1113_s0 = scalar_lea.vmem %s1112_s21, 2048  ;;  %p1114_p1 = scmp.lt.s32.totalorder %s1493_s22, %s1112_s21 }
  0x72   : > { %p1109_p0 = pnand %p1107_p7, %p1093_p12  ;;  %p1115_p9 = scmp.lt.s32.totalorder %s1113_s0, %s1106_s30 }
  0x74   : > { %p1110_p4 = pneg %p1109_p0  ;;  %p1116_p3 = por %p1115_p9, %p1114_p1 }
  0x76   : > { %p1117_p6 = pnand %p1116_p3, %p1110_p4 }
  0x78   : > { %1120 = shalt.err (!%p1117_p6)
}
  0x79   : > { %s1288_s13 = smov 128   ;;  %s1289_s14 = smov 8  }
  0x7a   : > { %s1871_s23 = scalar_lea.sflag [#allocation3], %s1471_s8  ;;  %s1872_s30 = sshll.u32 %s1277_s28, 10 }
  0x7b   : > { %957 = dma.hbm_to_vmem [thread:$0]  (!%p1489_p2), %s1483_s10, 1024, %s1493_s22, %s1871_s23, %s1288_s13, %s1288_s13, %s1289_s14  }
  0x7c   : > { %s1531_s0 = scalar_lea.hbm %s1841_s5, %s1872_s30  ;;  %s1873_s1 = sshll.u32 %s1471_s8, 6 }
  0x7d   : > { %s340_s2 = scalar_lea.vmem [#allocation12], %s1873_s1  ;;  %s337_s4 = scalar_lea.sflag [#allocation13], %s1471_s8 }
  0x7e   : > { %s350_s3 = sshll.u32 %s340_s2, 4  ;;  %s1121_s20 = scalar_lea.hbm %s1531_s0, 1024  ;;  %s1535_s3 = int_to_ptr.vmem [resolvable:$true] %s350_s3 }
  0x7f   : > { %p1122_p1 = scmp.ne.s32.totalorder %s1531_s0, %s1121_s20  ;;  %s1126_s23 = scalar_lea.hbm %s1841_s5, 2048 }
  0x80   : > { %p1127_p13 = scmp.lt.u32.totalorder %s1531_s0, %s1841_s5  ;;  %p1128_p5 = scmp.lt.u32.totalorder %s1126_s23, %s1121_s20 }
  0x81   : > { %p1124_p4 = pnand %p1122_p1, %p1093_p12  ;;  %p1130_p7 = scmp.lt.u32.totalorder %s1121_s20, %s1531_s0 }
  0x82   : > { %p1129_p11 = por %p1128_p5, %p1127_p13 }
  0x83   : > { %p1125_p10 = pneg %p1124_p4 }
  0x84   : > { %p1131_p0 = por %p1130_p7, %p1129_p11 }
  0x86   : > { %p1132_p9 = pnand %p1131_p0, %p1125_p10 }
  0x88   : > { %1135 = shalt.err (!%p1132_p9)
}
  0x89   : > { %s1136_s1 = scalar_lea.vmem %s1535_s3, 1024  ;;  %s1290_s2 = smov [#allocation12]  }
  0x8a   : > { %p1137_p3 = scmp.ne.s32.totalorder %s1535_s3, %s1136_s1  ;;  %s1141_s21 = sshll.u32 %s1290_s2, 4  ;;  %s1142_s21 = int_to_ptr.vmem [resolvable:$false] %s1141_s21 }
  0x8b   : > { %s1143_s10 = scalar_lea.vmem %s1142_s21, 2048  ;;  %p1144_p4 = scmp.lt.s32.totalorder %s1535_s3, %s1142_s21 }
  0x8c   : > { %p1139_p6 = pnand %p1137_p3, %p1093_p12  ;;  %p1145_p13 = scmp.lt.s32.totalorder %s1143_s10, %s1136_s1 }
  0x8e   : > { %p1140_p1 = pneg %p1139_p6  ;;  %p1146_p5 = por %p1145_p13, %p1144_p4 }
  0x90   : > { %p1147_p11 = pnand %p1146_p5, %p1140_p1 }
  0x92   : > { %1150 = shalt.err (!%p1147_p11)
}
  0x93   : > { %960 = dma.hbm_to_vmem [thread:$0]  (!%p1489_p2), %s1531_s0, 1024, %s1535_s3, %s337_s4, %s1288_s13, %s1288_s13, %s1289_s14  }
  0x94   : > { %362 = sbr.rel (%p1390_p8) target bundleno = 255 (0xff), region = 44  ;;  %p1874_p12 = scmp.ne.s32.totalorder (!%p1390_p8), %s1856_s9, 0 }
  0x9b   : > { %1232 = dma.done.wait (%p1874_p12), [#allocation5], 16  }
  0x9c   : > { %1234 = vsyncadd (%p1874_p12), [#allocation5], 4294967280 }
  0x9d   : > { %1236 = dma.done.wait (%p1874_p12), [#allocation6], 16  }
  0x9e   : > { %1238 = vsyncadd (%p1874_p12), [#allocation6], 4294967280 }
  0x9f   : > { %1240 = dma.done.wait (%p1874_p12), [#allocation9], 80  }
  0xa0   : > { %1242 = vsyncadd (%p1874_p12), [#allocation9], 4294967216  ;;  %s1581_s3 = sand.u32 1, %s1265_s25   ;;  %p1875_p8 = scmp.ne.s32.totalorder %s1858_s11, 0 }
  0xa1   : > { %s889_s4 = sshll.u32 %s1581_s3, 6  ;;  %s381_s16 = scalar_lea.sflag [#allocation3], %s1581_s3 }
  0xa2   : > { %s384_s20 = scalar_lea.vmem [#allocation11], %s889_s4 }
  0xa3   : > { %1244 = dma.done.wait (%p1875_p8), %s381_s16, 1024  }
  0xa4   : > { %1246 = vsyncadd (%p1875_p8), %s381_s16, 4294966272  ;;  %s390_s8 = scalar_lea.sflag [#allocation13], %s1581_s3  ;;  %s1590_s15 = scalar_lea.vmem [#allocation12], %s889_s4 }
  0xa5   : > { %1248 = dma.done.wait (%p1875_p8), %s390_s8, 1024  }
  0xa6   : > { %1250 = vsyncadd (%p1875_p8), %s390_s8, 4294966272 }
  0xa7   : > { %398 = sfence }
  0xa8   : > { %s447_s9 = sld [smem:[#allocation2 + %s1273_s27]]  ;;  %s1599_s14 = sshll.u32 %s1273_s27, 2  ;;  %v457_v0 = vld [vmem:[%s384_s20] sm:$0xff]  ;;  %v458_v1 = vld [vmem:[%s384_s20 + $0x8] sm:$0xff]  ;;  %v459_v2 = vld [vmem:[%s384_s20 + $0x10] sm:$0xff] }
  0xa9   : > { %s448_s13 = sld [smem:[#allocation7 + %s1273_s27]]  ;;  %v460_v3 = vld [vmem:[%s384_s20 + $0x18] sm:$0xff]  ;;  %v461_v4 = vld [vmem:[%s384_s20 + $0x20] sm:$0xff]  ;;  %v462_v5 = vld [vmem:[%s384_s20 + $0x28] sm:$0xff]  ;;  %s451_s2 = sadd.s32 1, %s1599_s14 }
  0xaa   : > { %v463_v6 = vld [vmem:[%s384_s20 + $0x30] sm:$0xff]  ;;  %s1602_s11 = sld [smem:[#allocation8 + %s1599_s14]]  ;;  %v464_v7 = vld [vmem:[%s384_s20 + $0x38] sm:$0xff]  ;;  %v1605_v8 = vld [vmem:[%s1590_s15] sm:$0xff]  ;;  %p1876_p10 = scmp.ne.s32.totalorder %s1868_s17, 0 }
  0xab   : > { %v1608_v9 = vld [vmem:[%s1590_s15 + $0x8] sm:$0xff]  ;;  %v1611_v10 = vld [vmem:[%s1590_s15 + $0x10] sm:$0xff]  ;;  %v1614_v11 = vld [vmem:[%s1590_s15 + $0x18] sm:$0xff]  ;;  %s1619_s0 = sld [smem:[#allocation10]]  ;;  %s1627_s22 = sld [smem:[#allocation10 + $0x1]] }
  0xac   : > { %v1617_v12 = vld [vmem:[%s1590_s15 + $0x20] sm:$0xff]  ;;  %v1622_v14 = vld [vmem:[%s1590_s15 + $0x28] sm:$0xff]  ;;  %v1625_v15 = vld [vmem:[%s1590_s15 + $0x30] sm:$0xff]  ;;  %s1629_s23 = sld [smem:[#allocation10 + $0x2]]  ;;  %s1631_s30 = sld [smem:[#allocation10 + $0x3]] }
  0xad   : > { %s1633_s19 = sld [smem:[#allocation10 + $0x80]]  ;;  %v1636_v24 = vld [vmem:[%s1590_s15 + $0x38] sm:$0xff]  ;;  %s1642_s1 = sld [smem:[#allocation10 + $0x81]] }
  0xae   : > { %v473_v13 = vstv %s447_s9  ;;  %s1648_s21 = sld [smem:[#allocation10 + $0x82]]  ;;  %s1658_s10 = sld [smem:[#allocation10 + $0x83]] }
  0xaf   : > { %v474_v16 = vmul.f32 %v473_v13, %v457_v0  ;;  %v475_v17 = vmul.f32 %v473_v13, %v458_v1  ;;  %v481_v18 = vmul.f32 %v473_v13, %v459_v2  ;;  %v482_v19 = vmul.f32 %v473_v13, %v460_v3  ;;  %s1667_s4 = sld [smem:[#allocation8 + %s451_s2]]  ;;  %s453_s15 = sadd.s32 2, %s1599_s14 }
  0xb0   : > { %v476_v20 = vstv %s448_s13  ;;  %v487_v21 = vmul.f32 %v473_v13, %v461_v4  ;;  %v488_v22 = vmul.f32 %v473_v13, %v462_v5  ;;  %v493_v23 = vmul.f32 %v473_v13, %v463_v6  ;;  %s1673_s16 = sld [smem:[#allocation10 + $0x100]]  ;;  %s1684_s20 = sld [smem:[#allocation10 + $0x101]] }
  0xb1   : > { %v477_v25 = vmul.f32 %v476_v20, %v1605_v8  ;;  %v478_v26 = vmul.f32 %v476_v20, %v1608_v9  ;;  %v483_v27 = vmul.f32 %v476_v20, %v1611_v10  ;;  %v484_v28 = vmul.f32 %v476_v20, %v1614_v11  ;;  %s1686_s8 = sld [smem:[#allocation10 + $0x102]]  ;;  %s1703_s13 = sld [smem:[#allocation10 + $0x103]] }
  0xb2   : > { %v489_v29 = vmul.f32 %v476_v20, %v1617_v12  ;;  %v490_v30 = vmul.f32 %v476_v20, %v1622_v14  ;;  %v494_v31 = vmul.f32 %v473_v13, %v464_v7  ;;  %v495_v32 = vmul.f32 %v476_v20, %v1625_v15  ;;  %s1698_s9 = sld [smem:[#allocation8 + %s453_s15]] }
  0xb3   : > { %v1650_v33 = vadd.f32 %v477_v25, %v474_v16  ;;  %v1652_v34 = vadd.f32 %v478_v26, %v475_v17  ;;  %v1654_v35 = vadd.f32 %v483_v27, %v481_v18  ;;  %v1656_v36 = vadd.f32 %v484_v28, %v482_v19 }
  0xb4   : > { %v1660_v37 = vadd.f32 %v489_v29, %v487_v21  ;;  %v1662_v38 = vadd.f32 %v490_v30, %v488_v22  ;;  %v496_v39 = vmul.f32 %v476_v20, %v1636_v24  ;;  %v1665_v40 = vadd.f32 %v495_v32, %v493_v23 }
  0xb5   : > { %v500_v41 = vstv %s1619_s0  ;;  %v504_v42 = vstv %s1627_s22  ;;  %v510_v43 = vstv %s1629_s23  ;;  %v523_v44 = vstv %s1602_s11  ;;  %s1709_s11 = sld [smem:[#allocation10 + $0x180]]  ;;  %s1711_s0 = sld [smem:[#allocation10 + $0x181]] }
  0xb6   : > { %v1675_v45 = vadd.f32 %v496_v39, %v494_v31  ;;  %v501_v46 = vmul.f32 %v500_v41, %v1650_v33  ;;  %v502_v47 = vmul.f32 %v500_v41, %v1652_v34  ;;  %v505_v48 = vmul.f32 %v504_v42, %v1654_v35  ;;  %s1720_s22 = sld [smem:[#allocation10 + $0x182]]  ;;  %s455_s23 = sadd.s32 3, %s1599_s14 }
  0xb7   : > { %v506_v49 = vmul.f32 %v504_v42, %v1656_v36  ;;  %v511_v50 = vmul.f32 %v510_v43, %v1660_v37  ;;  %v512_v51 = vmul.f32 %v510_v43, %v1662_v38  ;;  %v516_v52 = vstv %s1631_s30  ;;  %s1728_s30 = sld [smem:[#allocation10 + $0x183]] }
  0xb8   : > { %v507_v53 = vadd.f32 %v505_v48, %v501_v46  ;;  %v517_v54 = vmul.f32 %v516_v52, %v1665_v40  ;;  %v518_v55 = vmul.f32 %v516_v52, %v1675_v45  ;;  %v535_v56 = vstv %s1633_s19  ;;  %s1732_s14 = sld [smem:[#allocation8 + %s455_s23]]  ;;  %s891_s19 = sshll.u32 %s1581_s3, 3 }
  0xb9   : > { %v508_v57 = vadd.f32 %v506_v49, %v502_v47  ;;  %v536_v58 = vmul.f32 %v535_v56, %v1650_v33  ;;  %v537_v59 = vmul.f32 %v535_v56, %v1652_v34  ;;  %v539_v60 = vstv %s1642_s1  ;;  %s911_s1 = sshll.u32 %s1273_s27, 7  ;;  %s427_s2 = scalar_lea.vmem [#allocation14], %s891_s19 }
  0xba   : > { %v513_v61 = vadd.f32 %v511_v50, %v507_v53  ;;  %v540_v62 = vmul.f32 %v539_v60, %v1654_v35  ;;  %v541_v63 = vmul.f32 %v539_v60, %v1656_v36  ;;  %v545_v0 = vstv %s1648_s21  ;;  %s667_s21 = sshll.u32 %s427_s2, 4  ;;  %s1765_s27 = scalar_lea.hbm %s1843_s7, %s911_s1  ;;  %s1760_s21 = int_to_ptr.vmem [resolvable:$true] %s667_s21 }
  0xbb   : > { %v514_v1 = vadd.f32 %v512_v51, %v508_v57  ;;  %v546_v2 = vmul.f32 %v545_v0, %v1660_v37  ;;  %v547_v3 = vmul.f32 %v545_v0, %v1662_v38  ;;  %v551_v4 = vstv %s1658_s10  ;;  %s434_s10 = scalar_lea.vmem [#allocation15], %s891_s19 }
  0xbc   : > { %v519_v5 = vadd.f32 %v517_v54, %v513_v61  ;;  %v542_v6 = vadd.f32 %v540_v62, %v536_v58  ;;  %v543_v7 = vadd.f32 %v541_v63, %v537_v59  ;;  %v552_v13 = vmul.f32 %v551_v4, %v1665_v40 }
  0xbd   : > { %v520_v16 = vadd.f32 %v518_v55, %v514_v1  ;;  %v553_v17 = vmul.f32 %v551_v4, %v1675_v45  ;;  %v558_v18 = vstv %s1667_s4  ;;  %v570_v19 = vstv %s1673_s16  ;;  %s681_s4 = sshll.u32 %s434_s10, 4  ;;  %s1767_s4 = int_to_ptr.vmem [resolvable:$true] %s681_s4 }
  0xbe   : > { %v521_v20 = vsub.f32 %v1605_v8, %v519_v5  ;;  %v548_v21 = vadd.f32 %v546_v2, %v542_v6  ;;  %v549_v22 = vadd.f32 %v547_v3, %v543_v7  ;;  %v571_v23 = vmul.f32 %v570_v19, %v1650_v33 }
  0xbf   : > { %v522_v25 = vsub.f32 %v1608_v9, %v520_v16  ;;  %v572_v26 = vmul.f32 %v570_v19, %v1652_v34  ;;  %v574_v27 = vstv %s1684_s20  ;;  %v580_v28 = vstv %s1686_s8  ;;  %s1758_s8 = scalar_lea.hbm %s1842_s6, %s911_s1 }
  0xc0   : > { %v524_v29 = vsub.f32 %v521_v20, %v523_v44  ;;  %v554_v30 = vadd.f32 %v552_v13, %v548_v21  ;;  %v555_v31 = vadd.f32 %v553_v17, %v549_v22  ;;  %v575_v32 = vmul.f32 %v574_v27, %v1654_v35 }
  0xc1   : > { %v525_v8 = vsub.f32 %v522_v25, %v523_v44  ;;  %v576_v39 = vmul.f32 %v574_v27, %v1656_v36  ;;  %v581_v41 = vmul.f32 %v580_v28, %v1660_v37  ;;  %v582_v9 = vmul.f32 %v580_v28, %v1662_v38 }
  0xc2   : > { %v526_v42 = vand.u32 2147483647, %v524_v29  ;;  %v556_v43 = vsub.f32 %v1611_v10, %v554_v30  ;;  %v557_v46 = vsub.f32 %v1614_v11, %v555_v31  ;;  %v577_v47 = vadd.f32 %v575_v32, %v571_v23 }
  0xc3   : > { %v527_v48 = vand.u32 2147483647, %v525_v8  ;;  %v578_v49 = vadd.f32 %v576_v39, %v572_v26  ;;  %v586_v50 = vstv %s1703_s13  ;;  %v593_v44 = vstv %s1698_s9  ;;  %s648_s13 = scalar_lea.sflag [#allocation4], %s1581_s3 }
  0xc4   : > { %v559_v51 = vsub.f32 %v556_v43, %v558_v18  ;;  %v560_v52 = vsub.f32 %v557_v46, %v558_v18  ;;  %v583_v53 = vadd.f32 %v581_v41, %v577_v47  ;;  %v587_v54 = vmul.f32 %v586_v50, %v1665_v40 }
  0xc5   : > { %v584_v55 = vadd.f32 %v582_v9, %v578_v49  ;;  %v588_v10 = vmul.f32 %v586_v50, %v1675_v45  ;;  %v605_v56 = vstv %s1709_s11  ;;  %v609_v11 = vstv %s1711_s0  ;;  %s1151_s11 = scalar_lea.vmem %s1760_s21, 128  ;;  %s1291_s0 = smov [#allocation14]  }
  0xc6   : > { %v561_v57 = vand.u32 2147483647, %v559_v51  ;;  %v562_v58 = vand.u32 2147483647, %v560_v52  ;;  %v589_v59 = vadd.f32 %v587_v54, %v583_v53  ;;  %v606_v60 = vmul.f32 %v605_v56, %v1650_v33  ;;  %p1152_p2 = scmp.ne.s32.totalorder %s1760_s21, %s1151_s11 }
  0xc7   : > { %v590_v61 = vadd.f32 %v588_v10, %v584_v55  ;;  %v607_v62 = vmul.f32 %v605_v56, %v1652_v34  ;;  %v610_v63 = vmul.f32 %v609_v11, %v1654_v35  ;;  %v611_v0 = vmul.f32 %v609_v11, %v1656_v36 }
  0xc8   : > { %v563_v1 = vadd.f32 %v561_v57, %v526_v42  ;;  %v591_v2 = vsub.f32 %v1617_v12, %v589_v59  ;;  %v615_v3 = vstv %s1720_s22  ;;  %v564_v13 = vadd.f32 %v562_v58, %v527_v48  ;;  %p1153_p7 = pnand %p1152_p2, %p1876_p10  ;;  %s1155_s22 = sshll.u32 %s1291_s0, 4  ;;  %s1156_s22 = int_to_ptr.vmem [resolvable:$false] %s1155_s22 }
  0xc9   : > { %v592_v4 = vsub.f32 %v1622_v14, %v590_v61  ;;  %v612_v5 = vadd.f32 %v610_v63, %v606_v60  ;;  %v613_v6 = vadd.f32 %v611_v0, %v607_v62  ;;  %v616_v7 = vmul.f32 %v615_v3, %v1660_v37  ;;  %s1157_s23 = scalar_lea.vmem %s1156_s22, 256  ;;  %p1158_p9 = scmp.lt.s32.totalorder %s1760_s21, %s1156_s22 }
  0xca   : > { %v594_v33 = vsub.f32 %v591_v2, %v593_v44  ;;  %v617_v16 = vmul.f32 %v615_v3, %v1662_v38  ;;  %v621_v34 = vstv %s1728_s30  ;;  %v628_v12 = vstv %s1732_s14  ;;  %p1154_p0 = pneg %p1153_p7  ;;  %p1159_p3 = scmp.lt.s32.totalorder %s1157_s23, %s1151_s11 }
  0xcb   : > { %v595_v17 = vsub.f32 %v592_v4, %v593_v44  ;;  %v618_v35 = vadd.f32 %v616_v7, %v612_v5  ;;  %v622_v36 = vmul.f32 %v621_v34, %v1665_v40  ;;  %v623_v18 = vmul.f32 %v621_v34, %v1675_v45 }
  0xcc   : > { %v619_v19 = vadd.f32 %v617_v16, %v613_v6  ;;  %v530_v20 = vmul.f32 %v524_v29, %v524_v29  ;;  %v531_v14 = vmul.f32 %v525_v8, %v525_v8  ;;  %v596_v21 = vand.u32 2147483647, %v594_v33  ;;  %p1160_p6 = por %p1159_p3, %p1158_p9 }
  0xcd   : > { %v624_v22 = vadd.f32 %v622_v36, %v618_v35  ;;  %v565_v23 = vmul.f32 %v559_v51, %v559_v51  ;;  %v566_v37 = vmul.f32 %v560_v52, %v560_v52  ;;  %v597_v25 = vand.u32 2147483647, %v595_v17 }
  0xce   : > { %v625_v26 = vadd.f32 %v623_v18, %v619_v19  ;;  %v600_v27 = vmul.f32 %v594_v33, %v594_v33  ;;  %v601_v38 = vmul.f32 %v595_v17, %v595_v17  ;;  %v598_v45 = vadd.f32 %v596_v21, %v563_v1  ;;  %p1161_p1 = pnand %p1160_p6, %p1154_p0 }
  0xcf   : > { %v626_v28 = vsub.f32 %v1625_v15, %v624_v22  ;;  %v567_v30 = vadd.f32 %v565_v23, %v530_v20  ;;  %v568_v31 = vadd.f32 %v566_v37, %v531_v14  ;;  %v599_v8 = vadd.f32 %v597_v25, %v564_v13 }
  0xd0   : > { %v627_v40 = vsub.f32 %v1636_v24, %v625_v26 }
  0xd1   : > { %v629_v32 = vsub.f32 %v626_v28, %v628_v12  ;;  %v602_v29 = vadd.f32 %v600_v27, %v567_v30  ;;  %v603_v41 = vadd.f32 %v601_v38, %v568_v31 }
  0xd2   : > { %v630_v39 = vsub.f32 %v627_v40, %v628_v12 }
  0xd3   : > { %v631_v9 = vand.u32 2147483647, %v629_v32  ;;  %v635_v42 = vmul.f32 %v629_v32, %v629_v32 }
  0xd4   : > { %v632_v43 = vand.u32 2147483647, %v630_v39  ;;  %v636_v46 = vmul.f32 %v630_v39, %v630_v39 }
  0xd5   : > { %v633_v47 = vadd.f32 %v631_v9, %v598_v45  ;;  %v637_v48 = vadd.f32 %v635_v42, %v602_v29 }
  0xd6   : > { %v634_v15 = vadd.f32 %v632_v43, %v599_v8  ;;  %v638_v49 = vadd.f32 %v636_v46, %v603_v41 }
  0xd8   : > { %v639_v24 = vadd.f32 %v634_v15, %v633_v47  ;;  %v640_v50 = vadd.f32 %v638_v49, %v637_v48 }
  0xda   : > { %643 = vst [vmem:[%s427_s2] sm:$0xff] %v639_v24  ;;  %646 = vst [vmem:[%s434_s10] sm:$0xff] %v640_v50 }
  0xdb   : > { %1164 = shalt.err (!%p1161_p1)
}
  0xdc   : > { %s1165_s30 = scalar_lea.hbm %s1758_s8, 128  ;;  %s1169_s1 = scalar_lea.hbm %s1842_s6, 256 }
  0xdd   : > { %p1166_p4 = scmp.ne.s32.totalorder %s1758_s8, %s1165_s30  ;;  %p1170_p11 = scmp.lt.u32.totalorder %s1758_s8, %s1842_s6 }
  0xde   : > { %p1171_p12 = scmp.lt.u32.totalorder %s1169_s1, %s1165_s30  ;;  %p1173_p2 = scmp.lt.u32.totalorder %s1165_s30, %s1758_s8 }
  0xdf   : > { %p1167_p13 = pnand %p1166_p4, %p1876_p10 }
  0xe0   : > { %p1172_p8 = por %p1171_p12, %p1170_p11 }
  0xe1   : > { %p1168_p5 = pneg %p1167_p13 }
  0xe2   : > { %p1174_p7 = por %p1173_p2, %p1172_p8 }
  0xe4   : > { %p1175_p0 = pnand %p1174_p7, %p1168_p5 }
  0xe6   : > { %1178 = shalt.err (!%p1175_p0)
}
  0xe7   : > { %937 = dma.vmem_to_hbm [thread:$0]  (%p1876_p10), %s1760_s21, 128, %s1758_s8, %s648_s13  }
  0xe8   : > { %s653_s16 = scalar_lea.sflag [#allocation16], %s1581_s3  ;;  %s1179_s20 = scalar_lea.vmem %s1767_s4, 128 }
  0xe9   : > { %p1180_p9 = scmp.ne.s32.totalorder %s1767_s4, %s1179_s20  ;;  %s1292_s15 = smov [#allocation15]  }
  0xea   : > { %s1183_s9 = sshll.u32 %s1292_s15, 4  ;;  %s1184_s9 = int_to_ptr.vmem [resolvable:$false] %s1183_s9 }
  0xeb   : > { %p1181_p3 = pnand %p1180_p9, %p1876_p10  ;;  %s1185_s11 = scalar_lea.vmem %s1184_s9, 256 }
  0xec   : > { %p1186_p1 = scmp.lt.s32.totalorder %s1767_s4, %s1184_s9  ;;  %p1187_p4 = scmp.lt.s32.totalorder %s1185_s11, %s1179_s20 }
  0xed   : > { %p1182_p6 = pneg %p1181_p3 }
  0xee   : > { %p1188_p13 = por %p1187_p4, %p1186_p1 }
  0xf0   : > { %p1189_p5 = pnand %p1188_p13, %p1182_p6 }
  0xf2   : > { %1192 = shalt.err (!%p1189_p5)
}
  0xf3   : > { %s1193_s3 = scalar_lea.hbm %s1765_s27, 128  ;;  %s1197_s13 = scalar_lea.hbm %s1843_s7, 256 }
  0xf4   : > { %p1194_p11 = scmp.ne.s32.totalorder %s1765_s27, %s1193_s3  ;;  %p1198_p2 = scmp.lt.u32.totalorder %s1765_s27, %s1843_s7 }
  0xf5   : > { %p1199_p7 = scmp.lt.u32.totalorder %s1197_s13, %s1193_s3  ;;  %p1201_p9 = scmp.lt.u32.totalorder %s1193_s3, %s1765_s27 }
  0xf6   : > { %p1195_p12 = pnand %p1194_p11, %p1876_p10 }
  0xf7   : > { %p1200_p0 = por %p1199_p7, %p1198_p2 }
  0xf8   : > { %p1196_p8 = pneg %p1195_p12 }
  0xf9   : > { %p1202_p3 = por %p1201_p9, %p1200_p0 }
  0xfb   : > { %p1203_p6 = pnand %p1202_p3, %p1196_p8 }
  0xfd   : > { %1206 = shalt.err (!%p1203_p6)
}
  0xfe   : > { %938 = dma.vmem_to_hbm [thread:$0]  (%p1876_p10), %s1767_s4, 128, %s1765_s27, %s653_s16  }
  0xff PF: > { %s693_s23 = sand.u32 1, %s1261_s24   ;;  %p1877_p1 = scmp.ne.s32.totalorder %s1859_s12, 0 }
 0x100   : > { %p1878_p4 = scmp.ge.s32.totalorder %s1281_s29, 2  ;;  %s694_s30 = scalar_lea.sflag [#allocation4], %s693_s23 }
 0x102   : > { %p962_p13 = pnand %p1878_p4, %p1877_p1 }
 0x104   : > { %1252 = dma.done.wait (!%p962_p13), %s694_s30, 128  }
 0x105   : > { %1254 = vsyncadd (!%p962_p13), %s694_s30, 4294967168  ;;  %s703_s14 = scalar_lea.sflag [#allocation16], %s693_s23 }
 0x106   : > { %1256 = dma.done.wait (!%p962_p13), %s703_s14, 128  }
 0x107   : > { %1258 = vsyncadd (!%p962_p13), %s703_s14, 4294967168  ;;  %s33_s29 = sadd.s32 1, %s1281_s29   ;;  %s1879_s17 = sld [smem:[#allocation24_spill]] }
 0x108   : > { %p30_p5 = scmp.ge.s32.totalorder %s33_s29, 4   ;;  %s1880_s24 = smov %s1265_s25 }
 0x109   : > { %s1881_s25 = smov %s1269_s26  ;;  %s1882_s26 = smov %s1476_s18 }
 0x10a   : > { %s1883_s27 = smov %s1277_s28  ;;  %32 = sbr.rel (!%p30_p5) target bundleno = 19 (0x13), region = 141 }
 0x10d   : > { %s1884_s28 = smov %s1879_s17 }
 0x111   :  { %708 = vsyncpa [#allocation3], 1 }
 0x112   :  { %710 = vsyncpa [#allocation3 + $0x1], 1 }
 0x113   :  { %711 = vsyncpa [#allocation13], 1 }
 0x114   :  { %713 = vsyncpa [#allocation13 + $0x1], 1 }
 0x115   :  { %714 = vsyncpa [#allocation4], 1 }
 0x116   :  { %716 = vsyncpa [#allocation4 + $0x1], 1 }
 0x117   :  { %717 = vsyncpa [#allocation16], 1 }
 0x118   :  { %719 = vsyncpa [#allocation16 + $0x1], 1 }
 0x119   :  { %720 = vsyncpa [#allocation5], 1 }
 0x11a   :  { %722 = vsyncpa [#allocation5 + $0x1], 1 }
 0x11b   :  { %723 = vsyncpa [#allocation6], 1 }
 0x11c   :  { %725 = vsyncpa [#allocation6 + $0x1], 1 }
 0x11d   :  { %726 = vsyncpa [#allocation9], 1 }

</bundles_post_ra>
